<compile_context>
chip_gen: v7x
topology: tpu7x:2x2x1
jax: 0.10.0
libtpu: 0.0.40
codegen_flags: <defaults>
</compile_context>

<pallas_src>
import functools

import numpy as np
import jax
import jax.numpy as jnp
from jax import lax
from jax.experimental import pallas as pl
from jax.experimental.pallas import tpu as pltpu


def cbam_kernel(x_ref, w1_ref, w2_ref, b1_ref, b2_ref, col_ref, cw_ref, o_ref, *, H, W):
    # x_ref:  (1, C, HW) VMEM   (NCHW with spatial flattened onto lanes)
    # w1_ref: (CH, C) VMEM      w2_ref: (C, CH) VMEM
    # b1_ref: (CH, 1) VMEM      b2_ref: (C, 1) VMEM
    # col_ref:(1, HW) int32 VMEM  (column index of each flattened pixel)
    # cw_ref: (19,) SMEM        (18 conv taps, order [max, avg] x 3 x 3, + bias)
    x = x_ref[0]                                              # (C, HW) f32
    C, HW = x.shape
    f32 = jnp.float32

    # ---------------- channel attention (CAModule) ----------------
    f_avg = jnp.sum(x, axis=1, keepdims=True) * (1.0 / HW)    # (C, 1)  global avg pool
    f_max = jnp.max(x, axis=1, keepdims=True)                 # (C, 1)  global max pool

    # shared 1x1-conv MLP as MXU matmuls; mlp(a) + mlp(m) = W2 (relu_a + relu_m) + 2*b2
    h_a = jnp.maximum(
        jnp.dot(w1_ref[...], f_avg, preferred_element_type=f32) + b1_ref[...], 0.0)
    h_m = jnp.maximum(
        jnp.dot(w1_ref[...], f_max, preferred_element_type=f32) + b1_ref[...], 0.0)
    ca = jax.nn.sigmoid(
        jnp.dot(w2_ref[...], h_a + h_m, preferred_element_type=f32) + 2.0 * b2_ref[...])
    x_ca = x * ca                                             # (C, HW)

    # ---------------- spatial attention (SAModule) ----------------
    # channel mean on the (otherwise idle) MXU; channel max on the XLU
    s_avg = jnp.dot(jnp.ones((1, C), f32), x_ca,
                    preferred_element_type=f32) * (1.0 / C)   # (1, HW)
    s_max = jnp.max(x_ca, axis=0, keepdims=True)              # (1, HW)

    # 3x3 'same' conv on the flattened (H, W) maps: lane-dense rolls + edge masks.
    col = col_ref[...]                                        # (1, HW) int32
    idx = lax.broadcasted_iota(jnp.int32, (1, HW), 1)
    left_ok = col >= 1              # reading x-1 is valid
    right_ok = col <= (W - 2)       # reading x+1 is valid
    top_ok = idx >= W               # reading y-1 is valid
    bot_ok = idx < (H - 1) * W      # reading y+1 is valid

    def col_shift(m, dx):           # m[y, x+dx] with zero padding at the x edges
        if dx == 0:
            return m
        s = pltpu.roll(m, shift=(-dx) % HW, axis=1)
        return jnp.where(right_ok if dx > 0 else left_ok, s, 0.0)

    # 6 column-shifted maps, reused across the 3 row offsets (8 rolls total).
    cshift = [[col_shift(m, kx - 1) for kx in range(3)] for m in (s_max, s_avg)]

    acc = jnp.zeros((1, HW), f32) + cw_ref[18]                # conv bias
    for ky in range(3):
        dy = ky - 1
        part = jnp.zeros((1, HW), f32)
        for ci in range(2):         # torch cat order: channel 0 = max, 1 = avg
            for kx in range(3):
                part = part + cw_ref[ci * 9 + ky * 3 + kx] * cshift[ci][kx]
        if dy == 0:
            acc = acc + part
        else:
            rolled = pltpu.roll(part, shift=(-dy * W) % HW, axis=1)   # part[y+dy, x]
            acc = acc + jnp.where(bot_ok if dy > 0 else top_ok, rolled, 0.0)
    sa = jax.nn.sigmoid(acc)                                  # (1, HW)

    o_ref[0] = (x_ca * sa).astype(o_ref.dtype)


def cbam(x_nchw, w1, b1, w2, b2, conv_w, conv_b):
    """CBAM forward. x_nchw: (N, C, H, W). Params:
       w1: (CH, C), b1: (CH,), w2: (C, CH), b2: (C,), conv_w: (18,), conv_b: (1,)."""
    N, C, H, W = x_nchw.shape
    CH = w1.shape[0]
    HW = H * W

    # Free reshape (no transpose): NCHW stays NCHW, spatial flattened onto lanes.
    x = x_nchw.reshape(N, C, HW).astype(jnp.float32)
    b1_2d = b1.reshape(CH, 1).astype(jnp.float32)
    b2_2d = b2.reshape(C, 1).astype(jnp.float32)
    conv_params = jnp.concatenate([conv_w, conv_b]).astype(jnp.float32)      # (19,)
    col_ids = jnp.asarray((np.arange(HW, dtype=np.int32) % W).reshape(1, HW))

    kernel = functools.partial(cbam_kernel, H=H, W=W)
    out = pl.pallas_call(
        kernel,
        out_shape=jax.ShapeDtypeStruct((N, C, HW), jnp.float32),
        grid=(N,),
        in_specs=[
            pl.BlockSpec((1, C, HW), lambda n: (n, 0, 0)),
            pl.BlockSpec((CH, C), lambda n: (0, 0)),
            pl.BlockSpec((C, CH), lambda n: (0, 0)),
            pl.BlockSpec((CH, 1), lambda n: (0, 0)),
            pl.BlockSpec((C, 1), lambda n: (0, 0)),
            pl.BlockSpec((1, HW), lambda n: (0, 0)),
            pl.BlockSpec(memory_space=pltpu.MemorySpace.SMEM),
        ],
        out_specs=pl.BlockSpec((1, C, HW), lambda n: (n, 0, 0)),
        compiler_params=pltpu.CompilerParams(
            dimension_semantics=("parallel",),
            vmem_limit_bytes=32 * 1024 * 1024,
        ),
    )(x, w1.astype(jnp.float32), w2.astype(jnp.float32), b1_2d, b2_2d,
      col_ids, conv_params)

    return out.reshape(N, C, H, W)                            # free reshape back


def cbam_ref(x_nchw, w1, b1, w2, b2, conv_w, conv_b):
    """Pure-JAX reference matching the PyTorch CBAM forward (NCHW)."""
    hp = jax.lax.Precision.HIGHEST
    avg = x_nchw.mean(axis=(2, 3))                            # (N, C)
    mx = x_nchw.max(axis=(2, 3))                              # (N, C)

    def mlp(v):
        h = jnp.maximum(jnp.dot(v, w1.T, precision=hp) + b1, 0.0)
        return jnp.dot(h, w2.T, precision=hp) + b2

    ca = jax.nn.sigmoid(mlp(avg) + mlp(mx))                   # (N, C)
    x_ca = x_nchw * ca[:, :, None, None]

    s_avg = x_ca.mean(axis=1, keepdims=True)                  # (N,1,H,W)
    s_max = x_ca.max(axis=1, keepdims=True)                   # (N,1,H,W)
    f = jnp.concatenate([s_max, s_avg], axis=1)               # (N,2,H,W)
    k = conv_w.reshape(1, 2, 3, 3)                            # OIHW
    sa = jax.lax.conv_general_dilated(
        f, k, window_strides=(1, 1), padding="SAME",
        dimension_numbers=("NCHW", "OIHW", "NCHW"), precision=hp)
    sa = jax.nn.sigmoid(sa + conv_b.reshape(1, 1, 1, 1))
    return x_ca * sa


if __name__ == "__main__":
    # small shapes: reduction=16 requires C >= 16, so use C=32 (hidden = 2)
    N, C, H, W = 2, 32, 16, 16
    reduction = 16
    CH = C // reduction

    key = jax.random.PRNGKey(0)
    ks = jax.random.split(key, 7)
    x = jax.random.normal(ks[0], (N, C, H, W), jnp.float32)
    # deterministic synthetic parameters (shapes from the module's __init__)
    w1 = 0.1 * jax.random.normal(ks[1], (CH, C), jnp.float32)      # Conv2d(C, C//16, 1)
    b1 = 0.05 * jax.random.normal(ks[2], (CH,), jnp.float32)
    w2 = 0.1 * jax.random.normal(ks[3], (C, CH), jnp.float32)      # Conv2d(C//16, C, 1)
    b2 = 0.05 * jax.random.normal(ks[4], (C,), jnp.float32)
    conv_w = 0.1 * jax.random.normal(ks[5], (18,), jnp.float32)    # Conv2d(2, 1, 3) weights
    conv_b = 0.05 * jax.random.normal(ks[6], (1,), jnp.float32)

    out = cbam(x, w1, b1, w2, b2, conv_w, conv_b)
    jax.block_until_ready(out)

    ref = cbam_ref(x, w1, b1, w2, b2, conv_w, conv_b)
    err = float(jnp.max(jnp.abs(out - ref)))
    # In-kernel f32 MXU matmuls may use reduced-precision passes depending on backend
    # defaults, so the absolute tolerance vs the HIGHEST-precision reference is relaxed;
    # structural bugs (masks/shift direction/channel order) produce errors >> 1e-2.
    assert err < 1e-2, f"mismatch vs reference: max abs err = {err}"
    print("KERNEL_OK")
</pallas_src>

<mosaic_0001>
module attributes {stable_mosaic.version = 11 : i64} {
  func.func @cbam_kernel(%arg0: i32, %arg1: memref<1x32x256xf32, #tpu.memory_space<vmem>>, %arg2: memref<2x32xf32, #tpu.memory_space<vmem>>, %arg3: memref<32x2xf32, #tpu.memory_space<vmem>>, %arg4: memref<2x1xf32, #tpu.memory_space<vmem>>, %arg5: memref<32x1xf32, #tpu.memory_space<vmem>>, %arg6: memref<1x256xi32, #tpu.memory_space<vmem>>, %arg7: memref<19xf32, #tpu.memory_space<smem>>, %arg8: memref<1x32x256xf32, #tpu.memory_space<vmem>>) attributes {dimension_semantics = [#tpu.dimension_semantics<parallel>], iteration_bounds = array<i64: 2>, scalar_prefetch = 0 : i64, scratch_operands = 0 : i64, tpu.core_type = #tpu.core_type<tc>, window_params = [{transform_indices = @transform_0, window_bounds = array<i64: 1, 32, 256>}, {pipeline_mode = #tpu.pipeline_mode<synchronous>, transform_indices = @transform_1, window_bounds = array<i64: 2, 32>}, {pipeline_mode = #tpu.pipeline_mode<synchronous>, transform_indices = @transform_2, window_bounds = array<i64: 32, 2>}, {pipeline_mode = #tpu.pipeline_mode<synchronous>, transform_indices = @transform_3, window_bounds = array<i64: 2, 1>}, {pipeline_mode = #tpu.pipeline_mode<synchronous>, transform_indices = @transform_4, window_bounds = array<i64: 32, 1>}, {pipeline_mode = #tpu.pipeline_mode<synchronous>, transform_indices = @transform_5, window_bounds = array<i64: 1, 256>}, {transform_indices = @transform_6, window_bounds = array<i64: 19>}, {transform_indices = @transform_7, window_bounds = array<i64: 1, 32, 256>}]} {
    %c0 = arith.constant 0 : index
    %c0_0 = arith.constant 0 : index
    %c0_1 = arith.constant 0 : index
    %0 = vector.load %arg1[%c0, %c0_0, %c0_1] : memref<1x32x256xf32, #tpu.memory_space<vmem>>, vector<1x32x256xf32>
    %1 = vector.shape_cast %0 : vector<1x32x256xf32> to vector<32x256xf32>
    %cst = arith.constant dense<0.000000e+00> : vector<32xf32>
    %2 = vector.multi_reduction <add>, %1, %cst [1] : vector<32x256xf32> to vector<32xf32>
    %3 = vector.shape_cast %2 : vector<32xf32> to vector<32x1xf32>
    %cst_2 = arith.constant 3.906250e-03 : f32
    %4 = vector.broadcast %cst_2 : f32 to vector<32x1xf32>
    %5 = arith.mulf %3, %4 : vector<32x1xf32>
    %cst_3 = arith.constant dense<0xFF800000> : vector<32xf32>
    %6 = vector.multi_reduction <maximumf>, %1, %cst_3 [1] : vector<32x256xf32> to vector<32xf32>
    %7 = vector.shape_cast %6 : vector<32xf32> to vector<32x1xf32>
    %c0_4 = arith.constant 0 : index
    %c0_5 = arith.constant 0 : index
    %8 = vector.load %arg2[%c0_4, %c0_5] : memref<2x32xf32, #tpu.memory_space<vmem>>, vector<2x32xf32>
    %cst_6 = arith.constant dense<0.000000e+00> : vector<2x1xf32>
    %9 = tpu.matmul %8, %5, %cst_6 {dimension_numbers = #tpu.dot_dimension_numbers<[1], [0], [0], [1], [0, 0, 1, 1], [], []>} : vector<2x32xf32>, vector<32x1xf32>, vector<2x1xf32> -> vector<2x1xf32>
    %c0_7 = arith.constant 0 : index
    %c0_8 = arith.constant 0 : index
    %10 = vector.load %arg4[%c0_7, %c0_8] : memref<2x1xf32, #tpu.memory_space<vmem>>, vector<2x1xf32>
    %11 = arith.addf %9, %10 : vector<2x1xf32>
    %cst_9 = arith.constant 0.000000e+00 : f32
    %12 = vector.broadcast %cst_9 : f32 to vector<2x1xf32>
    %13 = arith.maximumf %11, %12 : vector<2x1xf32>
    %c0_10 = arith.constant 0 : index
    %c0_11 = arith.constant 0 : index
    %14 = vector.load %arg2[%c0_10, %c0_11] : memref<2x32xf32, #tpu.memory_space<vmem>>, vector<2x32xf32>
    %cst_12 = arith.constant dense<0.000000e+00> : vector<2x1xf32>
    %15 = tpu.matmul %14, %7, %cst_12 {dimension_numbers = #tpu.dot_dimension_numbers<[1], [0], [0], [1], [0, 0, 1, 1], [], []>} : vector<2x32xf32>, vector<32x1xf32>, vector<2x1xf32> -> vector<2x1xf32>
    %c0_13 = arith.constant 0 : index
    %c0_14 = arith.constant 0 : index
    %16 = vector.load %arg4[%c0_13, %c0_14] : memref<2x1xf32, #tpu.memory_space<vmem>>, vector<2x1xf32>
    %17 = arith.addf %15, %16 : vector<2x1xf32>
    %cst_15 = arith.constant 0.000000e+00 : f32
    %18 = vector.broadcast %cst_15 : f32 to vector<2x1xf32>
    %19 = arith.maximumf %17, %18 : vector<2x1xf32>
    %c0_16 = arith.constant 0 : index
    %c0_17 = arith.constant 0 : index
    %20 = vector.load %arg3[%c0_16, %c0_17] : memref<32x2xf32, #tpu.memory_space<vmem>>, vector<32x2xf32>
    %21 = arith.addf %13, %19 : vector<2x1xf32>
    %cst_18 = arith.constant dense<0.000000e+00> : vector<32x1xf32>
    %22 = tpu.matmul %20, %21, %cst_18 {dimension_numbers = #tpu.dot_dimension_numbers<[1], [0], [0], [1], [0, 0, 1, 1], [], []>} : vector<32x2xf32>, vector<2x1xf32>, vector<32x1xf32> -> vector<32x1xf32>
    %c0_19 = arith.constant 0 : index
    %c0_20 = arith.constant 0 : index
    %23 = vector.load %arg5[%c0_19, %c0_20] : memref<32x1xf32, #tpu.memory_space<vmem>>, vector<32x1xf32>
    %cst_21 = arith.constant 2.000000e+00 : f32
    %24 = vector.broadcast %cst_21 : f32 to vector<32x1xf32>
    %25 = arith.mulf %24, %23 : vector<32x1xf32>
    %26 = arith.addf %22, %25 : vector<32x1xf32>
    %27 = arith.negf %26 : vector<32x1xf32>
    %28 = math.exp %27 : vector<32x1xf32>
    %cst_22 = arith.constant 1.000000e+00 : f32
    %29 = vector.broadcast %cst_22 : f32 to vector<32x1xf32>
    %30 = arith.addf %29, %28 : vector<32x1xf32>
    %31 = arith.divf %29, %30 : vector<32x1xf32>
    %32 = vector.broadcast %31 : vector<32x1xf32> to vector<32x256xf32>
    %33 = arith.mulf %1, %32 : vector<32x256xf32>
    %cst_23 = arith.constant 1.000000e+00 : f32
    %34 = vector.broadcast %cst_23 : f32 to vector<1x32xf32>
    %cst_24 = arith.constant dense<0.000000e+00> : vector<1x256xf32>
    %35 = tpu.matmul %34, %33, %cst_24 {dimension_numbers = #tpu.dot_dimension_numbers<[1], [0], [0], [1], [0, 0, 1, 1], [], []>} : vector<1x32xf32>, vector<32x256xf32>, vector<1x256xf32> -> vector<1x256xf32>
    %cst_25 = arith.constant 3.125000e-02 : f32
    %36 = vector.broadcast %cst_25 : f32 to vector<1x256xf32>
    %37 = arith.mulf %35, %36 : vector<1x256xf32>
    %cst_26 = arith.constant dense<0xFF800000> : vector<256xf32>
    %38 = vector.multi_reduction <maximumf>, %33, %cst_26 [0] : vector<32x256xf32> to vector<256xf32>
    %39 = vector.shape_cast %38 : vector<256xf32> to vector<1x256xf32>
    %c0_27 = arith.constant 0 : index
    %c0_28 = arith.constant 0 : index
    %40 = vector.load %arg6[%c0_27, %c0_28] : memref<1x256xi32, #tpu.memory_space<vmem>>, vector<1x256xi32>
    %41 = tpu.iota {dimensions = array<i32: 1>} : vector<1x256xi32>
    %c1_i32 = arith.constant 1 : i32
    %42 = vector.broadcast %c1_i32 : i32 to vector<1x256xi32>
    %43 = arith.cmpi sge, %40, %42 : vector<1x256xi32>
    %c14_i32 = arith.constant 14 : i32
    %44 = vector.broadcast %c14_i32 : i32 to vector<1x256xi32>
    %45 = arith.cmpi sle, %40, %44 : vector<1x256xi32>
    %c16_i32 = arith.constant 16 : i32
    %46 = vector.broadcast %c16_i32 : i32 to vector<1x256xi32>
    %47 = arith.cmpi sge, %41, %46 : vector<1x256xi32>
    %c240_i32 = arith.constant 240 : i32
    %48 = vector.broadcast %c240_i32 : i32 to vector<1x256xi32>
    %49 = arith.cmpi slt, %41, %48 : vector<1x256xi32>
    %c1_i32_29 = arith.constant 1 : i32
    %50 = tpu.dynamic_rotate %39 by %c1_i32_29 dim 1 : vector<1x256xf32>, i32 -> vector<1x256xf32>
    %cst_30 = arith.constant 0.000000e+00 : f32
    %51 = vector.broadcast %cst_30 : f32 to vector<1x256xf32>
    %52 = arith.select %43, %50, %51 : vector<1x256xi1>, vector<1x256xf32>
    %c255_i32 = arith.constant 255 : i32
    %53 = tpu.dynamic_rotate %39 by %c255_i32 dim 1 : vector<1x256xf32>, i32 -> vector<1x256xf32>
    %cst_31 = arith.constant 0.000000e+00 : f32
    %54 = vector.broadcast %cst_31 : f32 to vector<1x256xf32>
    %55 = arith.select %45, %53, %54 : vector<1x256xi1>, vector<1x256xf32>
    %c1_i32_32 = arith.constant 1 : i32
    %56 = tpu.dynamic_rotate %37 by %c1_i32_32 dim 1 : vector<1x256xf32>, i32 -> vector<1x256xf32>
    %cst_33 = arith.constant 0.000000e+00 : f32
    %57 = vector.broadcast %cst_33 : f32 to vector<1x256xf32>
    %58 = arith.select %43, %56, %57 : vector<1x256xi1>, vector<1x256xf32>
    %c255_i32_34 = arith.constant 255 : i32
    %59 = tpu.dynamic_rotate %37 by %c255_i32_34 dim 1 : vector<1x256xf32>, i32 -> vector<1x256xf32>
    %cst_35 = arith.constant 0.000000e+00 : f32
    %60 = vector.broadcast %cst_35 : f32 to vector<1x256xf32>
    %61 = arith.select %45, %59, %60 : vector<1x256xi1>, vector<1x256xf32>
    %cst_36 = arith.constant 0.000000e+00 : f32
    %62 = vector.broadcast %cst_36 : f32 to vector<1x256xf32>
    %c18 = arith.constant 18 : index
    %63 = memref.load %arg7[%c18] : memref<19xf32, #tpu.memory_space<smem>>
    %64 = vector.broadcast %63 : f32 to vector<1x256xf32>
    %65 = arith.addf %62, %64 : vector<1x256xf32>
    %cst_37 = arith.constant 0.000000e+00 : f32
    %66 = vector.broadcast %cst_37 : f32 to vector<1x256xf32>
    %c0_38 = arith.constant 0 : index
    %67 = memref.load %arg7[%c0_38] : memref<19xf32, #tpu.memory_space<smem>>
    %68 = vector.broadcast %67 : f32 to vector<1x256xf32>
    %69 = arith.mulf %68, %52 : vector<1x256xf32>
    %70 = arith.addf %66, %69 : vector<1x256xf32>
    %c1 = arith.constant 1 : index
    %71 = memref.load %arg7[%c1] : memref<19xf32, #tpu.memory_space<smem>>
    %72 = vector.broadcast %71 : f32 to vector<1x256xf32>
    %73 = arith.mulf %72, %39 : vector<1x256xf32>
    %74 = arith.addf %70, %73 : vector<1x256xf32>
    %c2 = arith.constant 2 : index
    %75 = memref.load %arg7[%c2] : memref<19xf32, #tpu.memory_space<smem>>
    %76 = vector.broadcast %75 : f32 to vector<1x256xf32>
    %77 = arith.mulf %76, %55 : vector<1x256xf32>
    %78 = arith.addf %74, %77 : vector<1x256xf32>
    %c9 = arith.constant 9 : index
    %79 = memref.load %arg7[%c9] : memref<19xf32, #tpu.memory_space<smem>>
    %80 = vector.broadcast %79 : f32 to vector<1x256xf32>
    %81 = arith.mulf %80, %58 : vector<1x256xf32>
    %82 = arith.addf %78, %81 : vector<1x256xf32>
    %c10 = arith.constant 10 : index
    %83 = memref.load %arg7[%c10] : memref<19xf32, #tpu.memory_space<smem>>
    %84 = vector.broadcast %83 : f32 to vector<1x256xf32>
    %85 = arith.mulf %84, %37 : vector<1x256xf32>
    %86 = arith.addf %82, %85 : vector<1x256xf32>
    %c11 = arith.constant 11 : index
    %87 = memref.load %arg7[%c11] : memref<19xf32, #tpu.memory_space<smem>>
    %88 = vector.broadcast %87 : f32 to vector<1x256xf32>
    %89 = arith.mulf %88, %61 : vector<1x256xf32>
    %90 = arith.addf %86, %89 : vector<1x256xf32>
    %c16_i32_39 = arith.constant 16 : i32
    %91 = tpu.dynamic_rotate %90 by %c16_i32_39 dim 1 : vector<1x256xf32>, i32 -> vector<1x256xf32>
    %cst_40 = arith.constant 0.000000e+00 : f32
    %92 = vector.broadcast %cst_40 : f32 to vector<1x256xf32>
    %93 = arith.select %47, %91, %92 : vector<1x256xi1>, vector<1x256xf32>
    %94 = arith.addf %65, %93 : vector<1x256xf32>
    %cst_41 = arith.constant 0.000000e+00 : f32
    %95 = vector.broadcast %cst_41 : f32 to vector<1x256xf32>
    %c3 = arith.constant 3 : index
    %96 = memref.load %arg7[%c3] : memref<19xf32, #tpu.memory_space<smem>>
    %97 = vector.broadcast %96 : f32 to vector<1x256xf32>
    %98 = arith.mulf %97, %52 : vector<1x256xf32>
    %99 = arith.addf %95, %98 : vector<1x256xf32>
    %c4 = arith.constant 4 : index
    %100 = memref.load %arg7[%c4] : memref<19xf32, #tpu.memory_space<smem>>
    %101 = vector.broadcast %100 : f32 to vector<1x256xf32>
    %102 = arith.mulf %101, %39 : vector<1x256xf32>
    %103 = arith.addf %99, %102 : vector<1x256xf32>
    %c5 = arith.constant 5 : index
    %104 = memref.load %arg7[%c5] : memref<19xf32, #tpu.memory_space<smem>>
    %105 = vector.broadcast %104 : f32 to vector<1x256xf32>
    %106 = arith.mulf %105, %55 : vector<1x256xf32>
    %107 = arith.addf %103, %106 : vector<1x256xf32>
    %c12 = arith.constant 12 : index
    %108 = memref.load %arg7[%c12] : memref<19xf32, #tpu.memory_space<smem>>
    %109 = vector.broadcast %108 : f32 to vector<1x256xf32>
    %110 = arith.mulf %109, %58 : vector<1x256xf32>
    %111 = arith.addf %107, %110 : vector<1x256xf32>
    %c13 = arith.constant 13 : index
    %112 = memref.load %arg7[%c13] : memref<19xf32, #tpu.memory_space<smem>>
    %113 = vector.broadcast %112 : f32 to vector<1x256xf32>
    %114 = arith.mulf %113, %37 : vector<1x256xf32>
    %115 = arith.addf %111, %114 : vector<1x256xf32>
    %c14 = arith.constant 14 : index
    %116 = memref.load %arg7[%c14] : memref<19xf32, #tpu.memory_space<smem>>
    %117 = vector.broadcast %116 : f32 to vector<1x256xf32>
    %118 = arith.mulf %117, %61 : vector<1x256xf32>
    %119 = arith.addf %115, %118 : vector<1x256xf32>
    %120 = arith.addf %94, %119 : vector<1x256xf32>
    %cst_42 = arith.constant 0.000000e+00 : f32
    %121 = vector.broadcast %cst_42 : f32 to vector<1x256xf32>
    %c6 = arith.constant 6 : index
    %122 = memref.load %arg7[%c6] : memref<19xf32, #tpu.memory_space<smem>>
    %123 = vector.broadcast %122 : f32 to vector<1x256xf32>
    %124 = arith.mulf %123, %52 : vector<1x256xf32>
    %125 = arith.addf %121, %124 : vector<1x256xf32>
    %c7 = arith.constant 7 : index
    %126 = memref.load %arg7[%c7] : memref<19xf32, #tpu.memory_space<smem>>
    %127 = vector.broadcast %126 : f32 to vector<1x256xf32>
    %128 = arith.mulf %127, %39 : vector<1x256xf32>
    %129 = arith.addf %125, %128 : vector<1x256xf32>
    %c8 = arith.constant 8 : index
    %130 = memref.load %arg7[%c8] : memref<19xf32, #tpu.memory_space<smem>>
    %131 = vector.broadcast %130 : f32 to vector<1x256xf32>
    %132 = arith.mulf %131, %55 : vector<1x256xf32>
    %133 = arith.addf %129, %132 : vector<1x256xf32>
    %c15 = arith.constant 15 : index
    %134 = memref.load %arg7[%c15] : memref<19xf32, #tpu.memory_space<smem>>
    %135 = vector.broadcast %134 : f32 to vector<1x256xf32>
    %136 = arith.mulf %135, %58 : vector<1x256xf32>
    %137 = arith.addf %133, %136 : vector<1x256xf32>
    %c16 = arith.constant 16 : index
    %138 = memref.load %arg7[%c16] : memref<19xf32, #tpu.memory_space<smem>>
    %139 = vector.broadcast %138 : f32 to vector<1x256xf32>
    %140 = arith.mulf %139, %37 : vector<1x256xf32>
    %141 = arith.addf %137, %140 : vector<1x256xf32>
    %c17 = arith.constant 17 : index
    %142 = memref.load %arg7[%c17] : memref<19xf32, #tpu.memory_space<smem>>
    %143 = vector.broadcast %142 : f32 to vector<1x256xf32>
    %144 = arith.mulf %143, %61 : vector<1x256xf32>
    %145 = arith.addf %141, %144 : vector<1x256xf32>
    %c240_i32_43 = arith.constant 240 : i32
    %146 = tpu.dynamic_rotate %145 by %c240_i32_43 dim 1 : vector<1x256xf32>, i32 -> vector<1x256xf32>
    %cst_44 = arith.constant 0.000000e+00 : f32
    %147 = vector.broadcast %cst_44 : f32 to vector<1x256xf32>
    %148 = arith.select %49, %146, %147 : vector<1x256xi1>, vector<1x256xf32>
    %149 = arith.addf %120, %148 : vector<1x256xf32>
    %150 = arith.negf %149 : vector<1x256xf32>
    %151 = math.exp %150 : vector<1x256xf32>
    %cst_45 = arith.constant 1.000000e+00 : f32
    %152 = vector.broadcast %cst_45 : f32 to vector<1x256xf32>
    %153 = arith.addf %152, %151 : vector<1x256xf32>
    %154 = arith.divf %152, %153 : vector<1x256xf32>
    %155 = vector.broadcast %154 : vector<1x256xf32> to vector<32x256xf32>
    %156 = arith.mulf %33, %155 : vector<32x256xf32>
    %c0_46 = arith.constant 0 : index
    %c0_47 = arith.constant 0 : index
    %c0_48 = arith.constant 0 : index
    %157 = vector.load %arg8[%c0_46, %c0_47, %c0_48] : memref<1x32x256xf32, #tpu.memory_space<vmem>>, vector<1x32x256xf32>
    %158 = vector.shape_cast %157 : vector<1x32x256xf32> to vector<32x256xf32>
    %159 = vector.shape_cast %156 : vector<32x256xf32> to vector<1x32x256xf32>
    tpu.vector_store %arg8[%c0_46, %c0_47, %c0_48], %159 {strides = array<i32>} : memref<1x32x256xf32, #tpu.memory_space<vmem>>, vector<1x32x256xf32>,
    return
  }
  func.func @transform_0(%arg0: i32) -> (i32, i32, i32) {
    %c0_i32 = arith.constant 0 : i32
    %c0_i32_0 = arith.constant 0 : i32
    %c0_i32_1 = arith.constant 0 : i32
    return %arg0, %c0_i32, %c0_i32_0 : i32, i32, i32
  }
  func.func @transform_1(%arg0: i32) -> (i32, i32) {
    %c0_i32 = arith.constant 0 : i32
    %c0_i32_0 = arith.constant 0 : i32
    %c0_i32_1 = arith.constant 0 : i32
    return %c0_i32, %c0_i32_0 : i32, i32
  }
  func.func @transform_2(%arg0: i32) -> (i32, i32) {
    %c0_i32 = arith.constant 0 : i32
    %c0_i32_0 = arith.constant 0 : i32
    %c0_i32_1 = arith.constant 0 : i32
    return %c0_i32, %c0_i32_0 : i32, i32
  }
  func.func @transform_3(%arg0: i32) -> (i32, i32) {
    %c0_i32 = arith.constant 0 : i32
    %c0_i32_0 = arith.constant 0 : i32
    %c0_i32_1 = arith.constant 0 : i32
    return %c0_i32, %c0_i32_0 : i32, i32
  }
  func.func @transform_4(%arg0: i32) -> (i32, i32) {
    %c0_i32 = arith.constant 0 : i32
    %c0_i32_0 = arith.constant 0 : i32
    %c0_i32_1 = arith.constant 0 : i32
    return %c0_i32, %c0_i32_0 : i32, i32
  }
  func.func @transform_5(%arg0: i32) -> (i32, i32) {
    %c0_i32 = arith.constant 0 : i32
    %c0_i32_0 = arith.constant 0 : i32
    %c0_i32_1 = arith.constant 0 : i32
    return %c0_i32, %c0_i32_0 : i32, i32
  }
  func.func @transform_6(%arg0: i32) -> i32 {
    %c0_i32 = arith.constant 0 : i32
    %c0_i32_0 = arith.constant 0 : i32
    return %c0_i32 : i32
  }
  func.func @transform_7(%arg0: i32) -> (i32, i32, i32) {
    %c0_i32 = arith.constant 0 : i32
    %c0_i32_0 = arith.constant 0 : i32
    %c0_i32_1 = arith.constant 0 : i32
    return %arg0, %c0_i32, %c0_i32_0 : i32, i32, i32
  }
}

</mosaic_0001>

<bundles_post_ra>
// kernel: tpu_custom_call.1
= control target key start
LH: loop header
LB: loop body
LE: loop exit
PB: predicated region body
PF: predicated region fallthrough
CT: control target
= control target key end

     0   :  { %s2059_s0 = inlined_call_operand.hbm [shape: f32[2,32,256], index: 0, kind: input, shape index: {}]   ;;  %s2060_s1 = inlined_call_operand.vmem [shape: f32[2,32], index: 1, kind: input, shape index: {}]   ;;  %s2061_s2 = inlined_call_operand.vmem [shape: f32[32,2], index: 2, kind: input, shape index: {}]   ;;  %s2062_s3 = inlined_call_operand.vmem [shape: f32[2,1], index: 3, kind: input, shape index: {}]   ;;  %s2063_s4 = inlined_call_operand.vmem [shape: f32[32,1], index: 4, kind: input, shape index: {}]   ;;  %s2064_s5 = inlined_call_operand.vmem [shape: s32[1,256], index: 5, kind: input, shape index: {}]   ;;  %s2065_s6 = inlined_call_operand.vmem [shape: f32[19], index: 6, kind: input, shape index: {}]   ;;  %s2066_s7 = inlined_call_operand.hbm [shape: f32[2,32,256], index: 7, kind: output, shape index: {}]  }
   0x1   :  { %2070 = sst [smem:[#allocation11_spill]] %s2065_s6 }
   0x2   :  { %12 = vsyncpa [#allocation3], 0 }
   0x3   :  { %14 = vsyncpa [#allocation3 + $0x1], 0 }
   0x4   :  { %15 = vsyncpa [#allocation5], 0 }
   0x5   :  { %16 = vsyncpa [#allocation4], 0 }
   0x6   :  { %18 = vsyncpa [#allocation4 + $0x1], 0  ;;  %s1633_s24 = smov 0   ;;  %s1635_s25 = smov 0  }
   0x7   :  { %s1637_s26 = smov 0   ;;  %s1639_s27 = smov 0  }
   0x8 LB: > { %s1654_s28 = sadd.s32 4294967295, %s1575_s27   ;;  %s1249_s29 = sadd.s32 4294967294, %s1575_s27   ;;  %s1575_s27 = sphi %s1639_s27, %s2088_s27   ;;  %s1571_s26 = sphi %s1637_s26, %s2087_s26   ;;  %s1567_s25 = sphi %s1635_s25, %s2086_s25   ;;  %s1563_s24 = sphi %s1633_s24, %s2085_s24  }
   0x9   : > { %s1658_s30 = sadd.s32 1, %s1575_s27   ;;  %s31_s8 = sadd.s32 1, %s1571_s26 }
   0xa   : > { %s28_s9 = ssub.s32 %s1575_s27, %s1658_s30  ;;  %p38_p0 = scmp.ne.s32.totalorder %s1571_s26, %s1567_s25 }
   0xb   : > { %p29_p1 = scmp.eq.s32.totalorder %s28_s9, 0  ;;  %p39_p2 = scmp.eq.s32.totalorder %s1575_s27, 0 }
   0xc   : > { %p44_p3 = scmp.ne.s32.totalorder %s1567_s25, %s1563_s24  ;;  %p2068_p4 = scmp.eq.s32.totalorder %s1654_s28, 0 }
   0xd   : > { %s1670_s10 = scalar_select %p29_p1, %s1571_s26, %s31_s8  }
   0xe   : > { %p1672_p5 = por %p39_p2, %p38_p0  ;;  %p1678_p6 = por %p2068_p4, %p44_p3 }
   0xf   : > { %p194_p7 = scmp.eq.s32.totalorder %s1654_s28, 1  ;;  %p200_p8 = scmp.eq.s32.totalorder %s1249_s29, 1 }
  0x10   : > { %s2072_s12 = scalar_select %p1678_p6, 1, 0 }
  0x11   : > { %p1250_p9 = scmp.ge.s32.totalorder %s1575_s27, 1  ;;  %p207_p10 = scmp.lt.s32.totalorder %s1575_s27, 3 }
  0x12   : > { %p1685_p11 = por %p194_p7, %p38_p0  ;;  %p1689_p12 = por %p200_p8, %p44_p3 }
  0x13   : > { %p1693_p13 = pnand %p1250_p9, %p207_p10  ;;  %s2076_s6 = sld [smem:[#allocation11_spill]] }
  0x14   : > { %s2073_s13 = scalar_select %p1685_p11, 1, 0 }
  0x15   : > { %s2074_s14 = scalar_select %p1689_p12, 1, 0 }
  0x16   : > { %p1372_p1 = pneg %p1693_p13  ;;  %p1385_p2 = scmp.lt.s32.totalorder %s1575_s27, 2 }
  0x17   : > { %s246_s20 = sand.u32 1, %s1571_s26  }
  0x18   : > { %p1706_p7 = pnand %p1372_p1, %p2068_p4  ;;  %p1713_p3 = pnand %p1385_p2, %p1672_p5 }
  0x19   : > { %s235_s18 = sshll.u32 %s2076_s6, 4  ;;  %s1253_s22 = sshll.u32 %s246_s20, 6  ;;  %s236_s18 = int_to_ptr.vmem [resolvable:$true] %s235_s18 }
  0x1a   : > { %s1460_s23 = scalar_lea.vmem %s236_s18, 16  ;;  %p1462_p9 = pneg %p1706_p7 }
  0x1b   : > { %p1461_p8 = scmp.ne.s32.totalorder %s236_s18, %s1460_s23  ;;  %p1468_p12 = scmp.lt.s32.totalorder %s236_s18, %s236_s18 }
  0x1c   : > { %p1469_p11 = scmp.lt.s32.totalorder %s1460_s23, %s1460_s23 }
  0x1d   : > { %p1463_p10 = pnand %p1462_p9, %p1461_p8 }
  0x1e   : > { %p1470_p1 = por %p1469_p11, %p1468_p12 }
  0x1f   : > { %p1464_p0 = pneg %p1463_p10 }
  0x21   : > { %p1471_p4 = pnand %p1470_p1, %p1464_p0 }
  0x23   : > { %1474 = shalt.err (!%p1471_p4)
}
  0x24   : > { %s1577_s29 = smov [#allocation6]   ;;  %s1297_s8 = sshll.u32 %s1575_s27, 10 }
  0x25   : > { %1375 = dma.vmem_to_smem (!%p1706_p7), %s236_s18, 16, %s1577_s29, [#allocation5]  }
  0x26   : > { %s250_s9 = scalar_lea.vmem [#allocation2], %s1253_s22  ;;  %s1725_s6 = scalar_lea.hbm %s2059_s0, %s1297_s8 }
  0x27   : > { %s257_s11 = sshll.u32 %s250_s9, 4  ;;  %s1729_s23 = scalar_lea.sflag [#allocation3], %s246_s20  ;;  %s1727_s11 = int_to_ptr.vmem [resolvable:$true] %s257_s11 }
  0x28   : > { %s1475_s19 = scalar_lea.hbm %s1725_s6, 1024  ;;  %p1477_p5 = pneg %p1713_p3 }
  0x29   : > { %p1476_p4 = scmp.ne.s32.totalorder %s1725_s6, %s1475_s19  ;;  %s1480_s29 = scalar_lea.hbm %s2059_s0, 2048 }
  0x2a   : > { %p1481_p0 = scmp.lt.u32.totalorder %s1725_s6, %s2059_s0  ;;  %p1482_p2 = scmp.lt.u32.totalorder %s1480_s29, %s1475_s19 }
  0x2b   : > { %p1478_p11 = pnand %p1477_p5, %p1476_p4  ;;  %p1484_p8 = scmp.lt.u32.totalorder %s1475_s19, %s1725_s6 }
  0x2c   : > { %p1483_p7 = por %p1482_p2, %p1481_p0 }
  0x2d   : > { %p1479_p12 = pneg %p1478_p11 }
  0x2e   : > { %p1485_p9 = por %p1484_p8, %p1483_p7 }
  0x30   : > { %p1486_p10 = pnand %p1485_p9, %p1479_p12 }
  0x32   : > { %1489 = shalt.err (!%p1486_p10)
}
  0x33   : > { %s1490_s20 = scalar_lea.vmem %s1727_s11, 1024  ;;  %s1578_s16 = smov [#allocation2]  }
  0x34   : > { %p1491_p1 = scmp.ne.s32.totalorder %s1727_s11, %s1490_s20  ;;  %s1495_s17 = sshll.u32 %s1578_s16, 4  ;;  %s1496_s17 = int_to_ptr.vmem [resolvable:$false] %s1495_s17 }
  0x35   : > { %s1497_s18 = scalar_lea.vmem %s1496_s17, 2048  ;;  %p1498_p6 = scmp.lt.s32.totalorder %s1727_s11, %s1496_s17 }
  0x36   : > { %p1493_p4 = pnand %p1491_p1, %p1477_p5  ;;  %p1499_p0 = scmp.lt.s32.totalorder %s1497_s18, %s1490_s20 }
  0x38   : > { %p1494_p11 = pneg %p1493_p4  ;;  %p1500_p2 = por %p1499_p0, %p1498_p6 }
  0x3a   : > { %p1501_p7 = pnand %p1500_p2, %p1494_p11 }
  0x3c   : > { %1504 = shalt.err (!%p1501_p7)
}
  0x3d   : > { %s1579_s19 = smov 256   ;;  %s1580_s22 = smov 16  }
  0x3e   : > { %1379 = dma.hbm_to_vmem [thread:$0]  (!%p1713_p3), %s1725_s6, 1024, %s1727_s11, %s1729_s23, %s1579_s19, %s1579_s19, %s1580_s22  }
  0x3f   : > { %269 = sbr.rel (%p1693_p13) target bundleno = 1363 (0x553), region = 48  ;;  %s1760_s29 = sand.u32 (!%p1693_p13), 1, %s1567_s25  }
  0x40   : > { %s1257_s8 = sshll.u32 (!%p1693_p13), %s1760_s29, 6  ;;  %s272_s9 = scalar_lea.sflag (!%p1693_p13), [#allocation3], %s1760_s29 }
  0x41   : > { %s275_s20 = scalar_lea.vmem (!%p1693_p13), [#allocation2], %s1257_s8  ;;  %p2079_p6 = scmp.ne.s32.totalorder (!%p1693_p13), %s2072_s12, 0 }
  0x46   : > { %1550 = dma.done.wait (%p2079_p6), %s272_s9, 1024  }
  0x47   : > { %1552 = vsyncadd (%p2079_p6), %s272_s9, 4294966272  ;;  %p2080_p3 = scmp.eq.s32.totalorder %s1654_s28, 0 }
  0x49   : > { %1554 = dma.done.wait (%p2080_p3), [#allocation5], 16   ;;  %p2081_p13 = pmov %p2080_p3 }
  0x4b   : > { %1556 = vsyncadd (%p2081_p13), [#allocation5], 4294967280 }
  0x4c   : > { %284 = sfence }
  0x4d   : > { %v1774_v0 = vld [vmem:[%s275_s20] sm:$0xff]  ;;  %v1776_v1 = vld [vmem:[%s275_s20 + $0x8] sm:$0xff]  ;;  %v1778_v2 = vld [vmem:[%s275_s20 + $0x10] sm:$0xff]  ;;  %v1581_v16 = vmov 0.0|0.0   ;;  %vm1582_vm0 = vmmov 0   ;;  %v1583_v17 = vmov 0.0  }
  0x4e   : > { %v335_v3 = vmax.f32 %v1774_v0, %v1776_v1  ;;  %v319_v4 = vadd.f32 %v1776_v1, %v1774_v0  ;;  %v1784_v5 = vld [vmem:[%s275_s20 + $0x18] sm:$0xff]  ;;  %v1790_v8 = vld [vmem:[%s275_s20 + $0x30] sm:$0xff]  ;;  %v1794_v10 = vld [vmem:[%s275_s20 + $0x20] sm:$0xff]  ;;  %1350 = vmatprep.subr.bf16.mxu1 %v1581_v16  ;;  %1344 = vmatprep.subr.bf16.mxu0 %v1581_v16  ;;  %vm349_vm1 = vcmask 261120   ;;  %vm508_vm2 = vcmask 15360   ;;  %s1273_s17 = sld [smem:[#allocation6 + $0x1]] }
  0x4f   : > { %v338_v6 = vmax.f32 %v1778_v2, %v1784_v5  ;;  %v322_v7 = vadd.f32 %v1784_v5, %v1778_v2  ;;  %v1792_v9 = vld [vmem:[%s275_s20 + $0x38] sm:$0xff]  ;;  %v1796_v11 = vld [vmem:[%s275_s20 + $0x28] sm:$0xff]  ;;  %1322 = vmatprep.mubr.msk.f32.mxu0 %vm1582_vm0, %v1583_v17  ;;  %1333 = vmatprep.mubr.msk.f32.mxu1 %vm1582_vm0, %v1583_v17  ;;  %v347_v34 = vld [vmem:[%s2060_s1] sm:$0x3]  ;;  %vm521_vm3 = vcmask 1041408   ;;  %v1584_v49 = vmov 0  }
  0x50   : > { %336 = vmax.xlane.f32.xlu1 %v335_v3  ;;  %320 = vadd.xlane.f32.xlu0 %v319_v4  ;;  %v328_v12 = vadd.f32 %v1792_v9, %v1790_v8  ;;  %v325_v13 = vadd.f32 %v1796_v11, %v1794_v10  ;;  %v344_v14 = vmax.f32 %v1790_v8, %v1792_v9  ;;  %v495_v35 = vld [vmem:[%s2061_s2] sm:$0xff]  ;;  %v496_v46 = vld [vmem:[%s2061_s2 + $0x8] sm:$0xff]  ;;  %v497_v47 = vld [vmem:[%s2061_s2 + $0x10] sm:$0xff]  ;;  %s1279_s18 = sld [smem:[#allocation6 + $0x4]]  ;;  %s1285_s19 = sld [smem:[#allocation6 + $0x7]] }
  0x51   : > { %v341_v15 = vmax.f32 %v1794_v10, %v1796_v11  ;;  %v348_v36 = vld [vmem:[%s2062_s3] sm:$0x3]  ;;  %v498_v48 = vld [vmem:[%s2061_s2 + $0x18] sm:$0xff]  ;;  %1435 = vset.pattern.permute.xlu1 %v1584_v49  ;;  %1434 = vset.pattern.permute.xlu0 %v1584_v49  ;;  %v501_v50 = vld [vmem:[%s2063_s4 + $0x8] sm:$0xff]  ;;  %s1586_s22 = smov 1   ;;  %s1587_s9 = smov 127  }
  0x52   : > { %v500_v51 = vld [vmem:[%s2063_s4] sm:$0xff]  ;;  %v505_v52 = vmul.f32 2.0, %v501_v50  ;;  %v503_v54 = vld [vmem:[%s2063_s4 + $0x18] sm:$0xff]  ;;  %v502_v55 = vld [vmem:[%s2063_s4 + $0x10] sm:$0xff]  ;;  %s1278_s20 = sld [smem:[#allocation6 + $0x3]]  ;;  %s1280_s15 = sld [smem:[#allocation6 + $0x5]] }
  0x53   : > { %v504_v53 = vmul.f32 2.0, %v500_v51  ;;  %v507_v59 = vmul.f32 2.0, %v503_v54  ;;  %v506_v61 = vmul.f32 2.0, %v502_v55  ;;  %s1276_s21 = sld [smem:[#allocation6 + $0xa]]  ;;  %s1282_s11 = sld [smem:[#allocation6 + $0xd]] }
  0x54   : > { %339 = vmax.xlane.f32.xlu1 %v338_v6  ;;  %323 = vadd.xlane.f32.xlu0 %v322_v7  ;;  %v876_v51 = vstv %s1273_s17  ;;  %s1288_s23 = sld [smem:[#allocation6 + $0x10]]  ;;  %s1284_s17 = sld [smem:[#allocation6 + $0x6]] }
  0x55   : > { %s871_s16 = sld [smem:[#allocation6]]  ;;  %s1941_s6 = sld [smem:[#allocation6 + $0xc]] }
  0x56   : > { %s1961_s12 = sld [smem:[#allocation6 + $0x11]]  ;;  %p2082_p12 = scmp.ne.s32.totalorder %s2073_s13, 0 }
  0x58   : > { %329 = vadd.xlane.f32.xlu1 %v328_v12  ;;  %326 = vadd.xlane.f32.xlu0 %v325_v13 }
  0x5c   : > { %345 = vmax.xlane.f32.xlu1 %v344_v14  ;;  %342 = vmax.xlane.f32.xlu0 %v341_v15 }
  0xdd   : > { %v337_v18 = vpop.xlane.xlu1 %336  ;;  %v321_v19 = vpop.xlane.xlu0 %320 }
  0xde   : > { %v331_v22 = vmul.f32 0.00390625, %v321_v19 }
  0xe1   : > { %v340_v20 = vpop.xlane.xlu1 %339  ;;  %v324_v21 = vpop.xlane.xlu0 %323 }
  0xe2   : > { %v1351_v23 = vpack.c.bf16 %v340_v20, %v337_v18  ;;  %v332_v24 = vmul.f32 0.00390625, %v324_v21 }
  0xe4   : > { %1352 = vmatpush3.bf16.msra.mxu1 %v1351_v23  ;;  %v1345_v25 = vpack.c.bf16 %v332_v24, %v331_v22 }
  0xe5   : > { %v330_v26 = vpop.xlane.xlu1 %329  ;;  %v327_v27 = vpop.xlane.xlu0 %326  ;;  %1353 = vmatprep.subr.bf16.mxu1 %v1581_v16 }
  0xe6   : > { %v334_v28 = vmul.f32 0.00390625, %v330_v26  ;;  %v333_v29 = vmul.f32 0.00390625, %v327_v27  ;;  %1346 = vmatpush3.bf16.msra.mxu0 %v1345_v25 }
  0xe7   : > { %1347 = vmatprep.subr.bf16.mxu0 %v1581_v16 }
  0xe8   : > { %v1348_v30 = vpack.c.bf16 %v334_v28, %v333_v29 }
  0xe9   : > { %v346_v31 = vpop.xlane.xlu1 %345  ;;  %v343_v32 = vpop.xlane.xlu0 %342 }
  0xea   : > { %v1354_v33 = vpack.c.bf16 %v346_v31, %v343_v32  ;;  %1349 = vmatpush3.bf16.msra.mxu0 %v1348_v30 }
  0xec   : > { %1355 = vmatpush3.bf16.msra.mxu1 %v1354_v33 }
  0xed   : > { %1323 = vmatmul.mubr.msk.f32.vlgmr.msra.gmra.mrb[0].mxu0 %vm349_vm1, %v347_v34 }
  0xee   : > { %1338 = vmatprep.mubr.msk.f32.mxu0 %vm508_vm2, %v495_v35 }
  0xef   : > { %1334 = vmatmul.mubr.msk.f32.vlgmr.msra.gmra.mrb[0].mxu1 %vm349_vm1, %v347_v34 }
  0xf0   : > { %729 = vmatprep.mubr.f32.mxu1 %v1583_v17 }
 0x1c0   : > { %v419_v37 = vpop.f32.mrb[0].mxu0 }
 0x1c1   : > { %v420_v38 = vadd.f32 %v419_v37, %v348_v36  ;;  %v1324_v39 = vpop.f32.mrb[1].mxu0 }
 0x1c2   : > { %v490_v40 = vpop.f32.mrb[0].mxu1 }
 0x1c3   : > { %v423_v41 = vmax.f32 %v420_v38, 0.0  ;;  %v491_v42 = vadd.f32 %v490_v40, %v348_v36  ;;  %v1335_v43 = vpop.f32.mrb[1].mxu1 }
 0x1c5   : > { %v494_v44 = vmax.f32 %v491_v42, 0.0 }
 0x1c7   : > { %v499_v45 = vadd.f32 %v494_v44, %v423_v41  ;;  %v1585_v44 = vmov 1.0  }
 0x1c9   : > { %1336 = vmatprep.subr.msk.mxu0 %vm521_vm3, %v499_v45 }
 0x1ca   : > { %1337 = vmatpush3.msk.msra.mxu0 %vm521_vm3, %v499_v45 }
 0x1cb   : > { %1339 = vmatmul.mubr.msk.f32.vlgmr.msra.gmra.mrb[2].mxu0 %vm508_vm2, %v496_v46 }
 0x1cc   : > { %1341 = vmatprep.mubr.msk.f32.mxu0 %vm508_vm2, %v497_v47 }
 0x1cf   : > { %1342 = vmatmul.mubr.msk.f32.gmra.mrb[4].mxu0 %vm508_vm2, %v498_v48 }
 0x29e   : > { %v1340_v56 = vpop.f32.mrb[2].mxu0 }
 0x29f   : > { %v597_v57 = vadd.f32 %v1340_v56, %v505_v52  ;;  %v591_v58 = vpop.f32.mrb[3].mxu0  ;;  %v960_v52 = vstv %s1279_s18  ;;  %s1274_s18 = sld [smem:[#allocation6 + $0x2]] }
 0x2a0   : > { %v592_v60 = vadd.f32 %v591_v58, %v504_v53  ;;  %v1035_v53 = vstv %s1285_s19  ;;  %s1286_s19 = sld [smem:[#allocation6 + $0x8]] }
 0x2a1   : > { %v1268_v62 = vmul.f32 -1.442695, %v597_v57 }
 0x2a2   : > { %v1267_v63 = vmul.f32 -1.442695, %v592_v60  ;;  %v1343_v3 = vpop.f32.mrb[4].mxu0 }
 0x2a3   : > { %1436 = vpow2.f32 %v1268_v62  ;;  %v607_v4 = vadd.f32 %v1343_v3, %v507_v59  ;;  %v601_v6 = vpop.f32.mrb[5].mxu0 }
 0x2a4   : > { %1438 = vpow2.f32 %v1267_v63  ;;  %v602_v7 = vadd.f32 %v601_v6, %v506_v61  ;;  %v1588_v6 = vmov 1966171168  }
 0x2a5   : > { %v1270_v12 = vmul.f32 -1.442695, %v607_v4  ;;  %v757_v4 = vlaneseq }
 0x2a6   : > { %v1269_v13 = vmul.f32 -1.442695, %v602_v7  ;;  %v777_v7 = vunpack.c.l.s4 %v1588_v6 }
 0x2a7   : > { %1440 = vpow2.f32 %v1270_v12  ;;  %v1899_v12 = vand.u32 127, %v757_v4 }
 0x2a8   : > { %1442 = vpow2.f32 %v1269_v13 }
 0x2a9   : > { %vm770_vm4 = vcmp.lt.s32.totalorder %v1899_v12, 1  ;;  %vm796_vm6 = vcmp.lt.s32.totalorder %v1899_v12, 127  ;;  %vm948_vm8 = vcmp.lt.s32.totalorder %v1899_v12, 16  ;;  %vm762_vm9 = vcmp.ge.s32.totalorder %v1899_v12, 16 }
 0x2aa   : > { %vm1107_vm10 = vcmp.lt.s32.totalorder %v1899_v12, 112 }
 0x2ad   : > { %v1437_v14 = vpop.eup %1436 }
 0x2ae   : > { %v1439_v15 = vpop.eup %1438  ;;  %v623_v16 = vadd.f32 1.0, %v1437_v14  ;;  %v778_v14 = vunpack.c.0.s8 %v777_v7 }
 0x2af   : > { %v622_v17 = vadd.f32 1.0, %v1439_v15  ;;  %v1901_v15 = vshrl.u32 %v757_v4, 7 }
 0x2b0   : > { %1444 = vrcp.f32 %v623_v16 }
 0x2b1   : > { %v1441_v18 = vpop.eup %1440  ;;  %1446 = vrcp.f32 %v622_v17  ;;  %v1905_v17 = vsub.s32 %v778_v14, %v1901_v15 }
 0x2b2   : > { %v1443_v19 = vpop.eup %1442  ;;  %v625_v21 = vadd.f32 1.0, %v1441_v18 }
 0x2b3   : > { %v624_v20 = vadd.f32 1.0, %v1443_v19 }
 0x2b5   : > { %1448 = vrcp.f32 %v624_v20  ;;  %v1914_v20 = vld [vmem:[%s2064_s5] sm:$0x3] }
 0x2b6   : > { %1450 = vrcp.f32 %v625_v21  ;;  %vm760_vm5 = vcmp.ge.s32.totalorder %v1914_v20, 1  ;;  %vm761_vm7 = vcmp.le.s32.totalorder %v1914_v20, 14 }
 0x2ba   : > { %v1445_v22 = vpop.eup %1444 }
 0x2bb   : > { %v1447_v23 = vpop.eup %1446  ;;  %641 = vperm.xlu1 %1435, %v1445_v22  }
 0x2bc   : > { %636 = vperm.xlu0 %1434, %v1447_v23  }
 0x2bf   : > { %v1449_v24 = vpop.eup %1448 }
 0x2c0   : > { %646 = vperm.xlu1 %1435, %v1449_v24   ;;  %v1451_v25 = vpop.eup %1450 }
 0x2c4   : > { %651 = vperm.xlu1 %1435, %v1451_v25   ;;  %v956_v25 = vstv %s1278_s20  ;;  %s1939_s20 = sld [smem:[#allocation6 + $0x9]] }
 0x33a   : > { %v642_v26 = vpop.permute.xlu1 %641 }
 0x33b   : > { %v1843_v27 = vmul.f32 %v642_v26, %v1778_v2  ;;  %v1846_v28 = vmul.f32 %v642_v26, %v1784_v5  ;;  %v637_v29 = vpop.permute.xlu0 %636 }
 0x33c   : > { %v1849_v30 = vmul.f32 %v637_v29, %v1774_v0  ;;  %v1852_v31 = vmul.f32 %v637_v29, %v1776_v1 }
 0x33e   : > { %v1358_v32 = vpack.c.bf16 %v1843_v27, %v1849_v30  ;;  %v1356_v33 = vpack.c.bf16 %v1846_v28, %v1852_v31 }
 0x33f   : > { %v647_v34 = vpop.permute.xlu1 %646 }
 0x340   : > { %1357 = vmatprep.subr.bf16.mxu1 %v1356_v33  ;;  %v1859_v2 = vmul.f32 %v647_v34, %v1794_v10  ;;  %v1862_v5 = vmul.f32 %v647_v34, %v1796_v11 }
 0x341   : > { %1359 = vmatpush1.bf16.msra.mxu1 %v1358_v32 }
 0x342   : > { %v738_v36 = vmax.f32 %v1849_v30, %v1859_v2  ;;  %v747_v37 = vmax.f32 %v1852_v31, %v1862_v5 }
 0x343   : > { %v652_v0 = vpop.permute.xlu1 %651 }
 0x344   : > { %v1865_v35 = vmul.f32 %v652_v0, %v1790_v8  ;;  %v1868_v1 = vmul.f32 %v652_v0, %v1792_v9 }
 0x346   : > { %v1362_v10 = vpack.c.bf16 %v1865_v35, %v1859_v2  ;;  %v739_v11 = vmax.f32 %v1843_v27, %v1865_v35  ;;  %v748_v38 = vmax.f32 %v1846_v28, %v1868_v1  ;;  %v1360_v8 = vpack.c.bf16 %v1868_v1, %v1862_v5 }
 0x348   : > { %v740_v9 = vmax.f32 %v738_v36, %v739_v11  ;;  %v749_v39 = vmax.f32 %v747_v37, %v748_v38  ;;  %1361 = vmatprep.subr.bf16.mxu1 %v1360_v8  ;;  %v983_v38 = vstv %s1280_s15  ;;  %s1963_s15 = sld [smem:[#allocation6 + $0xe]] }
 0x349   : > { %1363 = vmatpush1.bf16.msra.mxu1 %v1362_v10 }
 0x34a   : > { %v741_v40 = vrot.slane %v740_v9, 4  ;;  %v750_v41 = vrot.slane %v749_v39, 4 }
 0x34c   : > { %v742_v42 = vmax.f32 %v740_v9, %v741_v40  ;;  %v751_v43 = vmax.f32 %v749_v39, %v750_v41  ;;  %1271 = vmatmul.mubr.msk.f32.vlgmr.msra.gmra.mrb[2].mxu1 %vm349_vm1, %v1585_v44  ;;  %v1066_v44 = vstv %s1288_s23  ;;  %s1272_s23 = sld [smem:[#allocation6 + $0x12]] }
 0x34e   : > { %v743_v45 = vrot.slane %v742_v42, 2  ;;  %v752_v46 = vrot.slane %v751_v43, 2 }
 0x350   : > { %v744_v47 = vmax.f32 %v742_v42, %v743_v45  ;;  %v753_v48 = vmax.f32 %v751_v43, %v752_v46  ;;  %v907_v42 = vstv %s1276_s21  ;;  %v991_v43 = vstv %s1282_s11  ;;  %s1589_s21 = smov 16   ;;  %s1590_s11 = smov 112  }
 0x352   : > { %v745_v49 = vrot.slane %v744_v47, 1  ;;  %v754_v50 = vrot.slane %v753_v48, 1 }
 0x354   : > { %v746_v54 = vmax.f32 %v744_v47, %v745_v49  ;;  %v755_v55 = vmax.f32 %v753_v48, %v754_v50 }
 0x356   : > { %766 = vrot.lane.b32.xlu1 %v746_v54, %s1586_s22  ;;  %v1884_v56 = vmul.f32 %v876_v51, %v755_v55  ;;  %v962_v57 = vmul.f32 %v960_v52, %v755_v55  ;;  %v1886_v58 = vmul.f32 %v1035_v53, %v755_v55  ;;  %v1888_v59 = vmul.f32 %v876_v51, %v746_v54 }
 0x357   : > { %v961_v60 = vmul.f32 %v960_v52, %v746_v54  ;;  %v1890_v61 = vmul.f32 %v1035_v53, %v746_v54 }
 0x358   : > { %v881_v62 = vcombine.low %v1888_v59, %v1884_v56 }
 0x359   : > { %v965_v63 = vcombine.low %v961_v60, %v962_v57  ;;  %v1040_v3 = vcombine.low %v1890_v61, %v1886_v58  ;;  %v872_v60 = vstv %s871_s16  ;;  %s1298_s16 = sshll.u32 %s1654_s28, 10  ;;  %s1151_s28 = scalar_lea.sflag [#allocation4], %s1760_s29 }
 0x35a   : > { %768 = vrot.lane.b32.xlu1 %v755_v55, %s1586_s22  ;;  %v888_v4 = vrot.slane %v881_v62, %v1905_v17 }
 0x35b   : > { %v972_v24 = vrot.slane %v965_v63, %v1905_v17  ;;  %v1031_v63 = vstv %s1284_s17  ;;  %v1047_v6 = vrot.slane %v1040_v3, %v1905_v17  ;;  %s310_s17 = scalar_lea.vmem [#allocation7], %s1257_s8 }
 0x35c   : > { %v895_v58 = vrot.slane %v888_v4, %v1905_v17 }
 0x35d   : > { %v979_v34 = vrot.slane %v972_v24, %v1905_v17  ;;  %v1054_v59 = vrot.slane %v1047_v6, %v1905_v17 }
 0x35e   : > { %792 = vrot.lane.b32.xlu1 %v746_v54, %s1587_s9 }
 0x362   : > { %794 = vrot.lane.b32.xlu1 %v755_v55, %s1587_s9 }
 0x3c8   : > { %v767_v13 = vpop.permute.xlu1 %766 }
 0x3cc   : > { %v769_v16 = vpop.permute.xlu1 %768 }
 0x3cd   : > { %v771_v18 = vsel %vm770_vm4, %v767_v13, %v769_v16  ;;  %v772_v19 = vsel %vm770_vm4, %v769_v16, %v767_v13  ;;  %v899_v16 = vstv %s1274_s18  ;;  %s1164_s18 = sshll.u32 %s310_s17, 4  ;;  %s2014_s18 = int_to_ptr.vmem [resolvable:$true] %s1164_s18 }
 0x3ce   : > { %v775_v21 = vcombine.low %v772_v19, %v771_v18  ;;  %v1058_v19 = vstv %s1286_s19  ;;  %s1505_s8 = scalar_lea.vmem %s2014_s18, 1024 }
 0x3cf   : > { %p1506_p5 = scmp.ne.s32.totalorder %s2014_s18, %s1505_s8 }
 0x3d0   : > { %v782_v22 = vrot.slane %v775_v21, %v1905_v17  ;;  %v793_v23 = vpop.permute.xlu1 %792 }
 0x3d1   : > { %p1507_p8 = pnand %p1506_p5, %p2082_p12 }
 0x3d2   : > { %v789_v26 = vrot.slane %v782_v22, %v1905_v17 }
 0x3d3   : > { %p1508_p9 = pneg %p1507_p8 }
 0x3d4   : > { %v791_v29 = vsel %vm760_vm5, %v789_v26, 0.0  ;;  %v795_v32 = vpop.permute.xlu1 %794 }
 0x3d5   : > { %v957_v33 = vmul.f32 %v956_v25, %v791_v29  ;;  %v797_v0 = vsel %vm796_vm6, %v793_v23, %v795_v32  ;;  %v798_v36 = vsel %vm796_vm6, %v795_v32, %v793_v23  ;;  %v873_v13 = vmul.f32 %v872_v60, %v791_v29 }
 0x3d6   : > { %v801_v10 = vcombine.low %v797_v0, %v798_v36  ;;  %v1032_v14 = vmul.f32 %v1031_v63, %v791_v29  ;;  %v903_v29 = vstv %s1939_s20  ;;  %v987_v32 = vstv %s1941_s6  ;;  %s2008_s6 = scalar_lea.hbm %s2066_s7, %s1298_s16 }
 0x3d7   : > { %v981_v37 = vadd.f32 %v979_v34, %v957_v33  ;;  %v897_v22 = vadd.f32 %v895_v58, %v873_v13  ;;  %v759_v58 = vadd.s32 128, %v1899_v12 }
 0x3d8   : > { %v808_v11 = vrot.slane %v801_v10, %v1905_v17  ;;  %v1056_v23 = vadd.f32 %v1054_v59, %v1032_v14 }
 0x3d9   : > { %vm765_vm11 = vcmp.lt.s32.totalorder %v759_v58, 240 }
 0x3da   : > { %v815_v8 = vrot.slane %v808_v11, %v1905_v17 }
 0x3dc   : > { %v817_v9 = vsel %vm761_vm7, %v815_v8, 0.0 }
 0x3dd   : > { %v984_v39 = vmul.f32 %v983_v38, %v817_v9  ;;  %v900_v62 = vmul.f32 %v899_v16, %v817_v9  ;;  %v1059_v24 = vmul.f32 %v1058_v19, %v817_v9 }
 0x3df   : > { %v1933_v40 = vadd.f32 %v984_v39, %v981_v37  ;;  %v901_v11 = vadd.f32 %v900_v62, %v897_v22  ;;  %v1060_v39 = vadd.f32 %v1059_v24, %v1056_v23 }
 0x41f   : > { %v731_v41 = vpop.f32.mrb[2].mxu1 }
 0x420   : > { %v736_v45 = vmul.f32 0.03125, %v731_v41  ;;  %v733_v46 = vpop.f32.mrb[3].mxu1 }
 0x421   : > { %v737_v47 = vmul.f32 0.03125, %v733_v46 }
 0x422   : > { %v908_v48 = vmul.f32 %v907_v42, %v736_v45  ;;  %v992_v49 = vmul.f32 %v991_v43, %v736_v45  ;;  %v1067_v50 = vmul.f32 %v1066_v44, %v736_v45  ;;  %818 = vrot.lane.b32.xlu1 %v736_v45, %s1586_s22 }
 0x423   : > { %v909_v51 = vmul.f32 %v907_v42, %v737_v47  ;;  %v993_v52 = vmul.f32 %v991_v43, %v737_v47  ;;  %v1068_v53 = vmul.f32 %v1066_v44, %v737_v47  ;;  %820 = vrot.lane.b32.xlu0 %v737_v47, %s1586_s22  ;;  %s1951_s22 = sld [smem:[#allocation6 + $0xf]] }
 0x425   : > { %v996_v54 = vcombine.low %v992_v49, %v993_v52  ;;  %v912_v55 = vcombine.low %v908_v48, %v909_v51  ;;  %v1071_v57 = vcombine.low %v1067_v50, %v1068_v53  ;;  %v1089_v48 = vstv %s1961_s12 }
 0x426   : > { %843 = vrot.lane.b32.xlu1 %v736_v45, %s1587_s9  ;;  %v1014_v49 = vstv %s1963_s15 }
 0x427   : > { %845 = vrot.lane.b32.xlu0 %v737_v47, %s1587_s9  ;;  %s1957_s9 = sld [smem:[#allocation6 + $0xb]]  ;;  %v919_v10 = vrot.slane %v912_v55, %v1905_v17  ;;  %v1078_v38 = vrot.slane %v1071_v57, %v1905_v17  ;;  %v1003_v41 = vrot.slane %v996_v54, %v1905_v17  ;;  %v940_v54 = vsub.s32 1, %v1901_v15 }
 0x428   : > { %v936_v57 = vsub.s32 0, %v1901_v15 }
 0x429   : > { %v1062_v0 = vstv %s1951_s22  ;;  %v926_v47 = vrot.slane %v919_v10, %v1905_v17  ;;  %v1085_v52 = vrot.slane %v1078_v38, %v1905_v17  ;;  %v1010_v60 = vrot.slane %v1003_v41, %v1905_v17  ;;  %s1591_s22 = smov [#allocation7]  }
 0x42d   : > { %v930_v45 = vstv %s1957_s9  ;;  %s1509_s9 = sshll.u32 %s1591_s22, 4  ;;  %s1510_s9 = int_to_ptr.vmem [resolvable:$false] %s1509_s9 }
 0x42e   : > { %s1511_s12 = scalar_lea.vmem %s1510_s9, 2048  ;;  %p1512_p10 = scmp.lt.s32.totalorder %s2014_s18, %s1510_s9 }
 0x42f   : > { %p1513_p1 = scmp.lt.s32.totalorder %s1511_s12, %s1505_s8 }
 0x431   : > { %p1514_p4 = por %p1513_p1, %p1512_p10 }
 0x433   : > { %p1515_p11 = pnand %p1514_p4, %p1508_p9 }
 0x494   : > { %v819_v7 = vpop.permute.xlu1 %818 }
 0x495   : > { %v821_v18 = vpop.permute.xlu0 %820 }
 0x496   : > { %v822_v21 = vsel %vm770_vm4, %v819_v7, %v821_v18  ;;  %v823_v56 = vsel %vm770_vm4, %v821_v18, %v819_v7 }
 0x497   : > { %v826_v61 = vcombine.low %v823_v56, %v822_v21 }
 0x498   : > { %v844_v3 = vpop.permute.xlu1 %843 }
 0x499   : > { %v833_v25 = vrot.slane %v826_v61, %v1905_v17  ;;  %v846_v26 = vpop.permute.xlu0 %845 }
 0x49a   : > { %v847_v33 = vsel %vm796_vm6, %v844_v3, %v846_v26  ;;  %v848_v34 = vsel %vm796_vm6, %v846_v26, %v844_v3 }
 0x49b   : > { %v840_v36 = vrot.slane %v833_v25, %v1905_v17  ;;  %v851_v37 = vcombine.low %v847_v33, %v848_v34 }
 0x49d   : > { %v842_v8 = vsel %vm760_vm5, %v840_v36, 0.0  ;;  %v858_v9 = vrot.slane %v851_v37, %v1905_v17 }
 0x49e   : > { %v904_v42 = vmul.f32 %v903_v29, %v842_v8  ;;  %v988_v43 = vmul.f32 %v987_v32, %v842_v8  ;;  %v1063_v44 = vmul.f32 %v1062_v0, %v842_v8 }
 0x49f   : > { %v865_v46 = vrot.slane %v858_v9, %v1905_v17  ;;  %v869_v17 = vstv %s1272_s23 }
 0x4a0   : > { %v905_v50 = vadd.f32 %v904_v42, %v901_v11  ;;  %v1064_v51 = vadd.f32 %v1063_v44, %v1060_v39  ;;  %v989_v53 = vadd.f32 %v988_v43, %v1933_v40 }
 0x4a1   : > { %v867_v55 = vsel %vm761_vm7, %v865_v46, 0.0 }
 0x4a2   : > { %v928_v63 = vadd.f32 %v926_v47, %v905_v50  ;;  %v931_v4 = vmul.f32 %v930_v45, %v867_v55  ;;  %v1087_v6 = vadd.f32 %v1085_v52, %v1064_v51  ;;  %v1090_v7 = vmul.f32 %v1089_v48, %v867_v55 }
 0x4a3   : > { %v1012_v13 = vadd.f32 %v1010_v60, %v989_v53  ;;  %v1015_v14 = vmul.f32 %v1014_v49, %v867_v55 }
 0x4a4   : > { %v932_v16 = vadd.f32 %v931_v4, %v928_v63  ;;  %v1091_v40 = vadd.f32 %v1090_v7, %v1087_v6 }
 0x4a5   : > { %v1016_v18 = vadd.f32 %v1015_v14, %v1012_v13 }
 0x4a6   : > { %v941_v19 = vrot.slane %v932_v16, %v940_v54  ;;  %v937_v21 = vrot.slane %v932_v16, %v936_v57  ;;  %v1100_v15 = vrot.slane %v1091_v40, %v940_v54  ;;  %v1096_v20 = vrot.slane %v1091_v40, %v936_v57 }
 0x4a7   : > { %v1025_v56 = vrot.slane %v1016_v18, %v940_v54  ;;  %v1021_v25 = vrot.slane %v1016_v18, %v936_v57 }
 0x4a8   : > { %946 = vrot.lane.b32.xlu0 %v941_v19, %s1589_s21  ;;  %944 = vrot.lane.b32.xlu1 %v937_v21, %s1589_s21 }
 0x4ac   : > { %1105 = vrot.lane.b32.xlu0 %v1100_v15, %s1590_s11  ;;  %1103 = vrot.lane.b32.xlu1 %v1096_v20, %s1590_s11 }
 0x51a   : > { %v947_v59 = vpop.permute.xlu0 %946  ;;  %v945_v61 = vpop.permute.xlu1 %944 }
 0x51b   : > { %v949_v62 = vsel %vm948_vm8, %v945_v61, %v947_v59  ;;  %v950_v3 = vsel %vm948_vm8, %v947_v59, %v945_v61 }
 0x51c   : > { %v951_v22 = vsel %vm762_vm9, %v950_v3, 0.0  ;;  %v954_v23 = vadd.f32 %v949_v62, %v869_v17 }
 0x51d   : > { %v953_v24 = vadd.f32 %v951_v22, %v869_v17 }
 0x51e   : > { %v1029_v26 = vadd.f32 %v1025_v56, %v954_v23  ;;  %v1106_v29 = vpop.permute.xlu0 %1105  ;;  %v1104_v32 = vpop.permute.xlu1 %1103 }
 0x51f   : > { %v1028_v33 = vadd.f32 %v1021_v25, %v953_v24  ;;  %v1108_v34 = vsel %vm1107_vm10, %v1104_v32, %v1106_v29  ;;  %v1109_v0 = vsel %vm1107_vm10, %v1106_v29, %v1104_v32 }
 0x520   : > { %v1111_v36 = vsel %vm765_vm11, %v1109_v0, 0.0 }
 0x521   : > { %v1112_v37 = vadd.f32 %v1108_v34, %v1028_v33  ;;  %v1113_v10 = vadd.f32 %v1111_v36, %v1029_v26 }
 0x523   : > { %v1290_v11 = vmul.f32 -1.442695, %v1112_v37  ;;  %v1291_v38 = vmul.f32 -1.442695, %v1113_v10 }
 0x525   : > { %1452 = vpow2.f32 %v1290_v11 }
 0x526   : > { %1454 = vpow2.f32 %v1291_v38 }
 0x52f   : > { %v1453_v8 = vpop.eup %1452 }
 0x530   : > { %v1455_v12 = vpop.eup %1454  ;;  %v1120_v9 = vadd.f32 1.0, %v1453_v8 }
 0x531   : > { %v1121_v39 = vadd.f32 1.0, %v1455_v12 }
 0x532   : > { %1456 = vrcp.f32 %v1120_v9 }
 0x533   : > { %1458 = vrcp.f32 %v1121_v39 }
 0x53c   : > { %v1457_v41 = vpop.eup %1456 }
 0x53d   : > { %v1459_v42 = vpop.eup %1458  ;;  %v1129_v43 = vrot.slane %v1457_v41, %v936_v57 }
 0x53e   : > { %v1133_v44 = vrot.slane %v1459_v42, %v936_v57 }
 0x53f   : > { %v1134_v45 = vmul.f32 %v1129_v43, %v1849_v30  ;;  %v1136_v46 = vmul.f32 %v1129_v43, %v1843_v27  ;;  %v1138_v47 = vmul.f32 %v1129_v43, %v1859_v2  ;;  %v1140_v48 = vmul.f32 %v1129_v43, %v1865_v35 }
 0x540   : > { %v1135_v49 = vmul.f32 %v1133_v44, %v1852_v31  ;;  %v1137_v50 = vmul.f32 %v1133_v44, %v1846_v28  ;;  %v1139_v51 = vmul.f32 %v1133_v44, %v1862_v5  ;;  %v1141_v30 = vmul.f32 %v1133_v44, %v1868_v1 }
 0x541   : > { %1142 = vst [vmem:[%s310_s17] sm:$0xff] %v1134_v45  ;;  %1144 = vst [vmem:[%s310_s17 + $0x10] sm:$0xff] %v1136_v46 }
 0x542   : > { %1146 = vst [vmem:[%s310_s17 + $0x20] sm:$0xff] %v1138_v47  ;;  %1148 = vst [vmem:[%s310_s17 + $0x30] sm:$0xff] %v1140_v48 }
 0x543   : > { %1143 = vst [vmem:[%s310_s17 + $0x8] sm:$0xff] %v1135_v49  ;;  %1145 = vst [vmem:[%s310_s17 + $0x18] sm:$0xff] %v1137_v50 }
 0x544   : > { %1147 = vst [vmem:[%s310_s17 + $0x28] sm:$0xff] %v1139_v51  ;;  %1149 = vst [vmem:[%s310_s17 + $0x38] sm:$0xff] %v1141_v30 }
 0x545   : > { %1518 = shalt.err (!%p1515_p11)
}
 0x546   : > { %s1519_s15 = scalar_lea.hbm %s2008_s6, 1024  ;;  %s1523_s16 = scalar_lea.hbm %s2066_s7, 2048 }
 0x547   : > { %p1520_p0 = scmp.ne.s32.totalorder %s2008_s6, %s1519_s15  ;;  %p1524_p6 = scmp.lt.u32.totalorder %s2008_s6, %s2066_s7 }
 0x548   : > { %p1525_p3 = scmp.lt.u32.totalorder %s1523_s16, %s1519_s15  ;;  %p1527_p5 = scmp.lt.u32.totalorder %s1519_s15, %s2008_s6 }
 0x549   : > { %p1521_p2 = pnand %p1520_p0, %p2082_p12 }
 0x54a   : > { %p1526_p13 = por %p1525_p3, %p1524_p6 }
 0x54b   : > { %p1522_p7 = pneg %p1521_p2 }
 0x54c   : > { %p1528_p8 = por %p1527_p5, %p1526_p13 }
 0x54e   : > { %p1529_p9 = pnand %p1528_p8, %p1522_p7 }
 0x550   : > { %1532 = shalt.err (!%p1529_p9)
}
 0x551   : > { %s1592_s20 = smov 256  }
 0x552   : > { %1370 = dma.vmem_to_hbm [thread:$0]  (%p2082_p12), %s2014_s18, 1024, %s2008_s6, %s1151_s28, %s1592_s20, %s1592_s20, %s1589_s21  }
 0x553 PF: > { %s1179_s8 = sand.u32 1, %s1563_s24   ;;  %p2083_p10 = scmp.ne.s32.totalorder %s2074_s14, 0 }
 0x554   : > { %p2084_p1 = scmp.ge.s32.totalorder %s1575_s27, 2  ;;  %s1180_s22 = scalar_lea.sflag [#allocation4], %s1179_s8 }
 0x556   : > { %p1381_p4 = pnand %p2084_p1, %p2083_p10 }
 0x558   : > { %1558 = dma.done.wait (!%p1381_p4), %s1180_s22, 1024  }
 0x559   : > { %1560 = vsyncadd (!%p1381_p4), %s1180_s22, 4294966272  ;;  %p21_p11 = scmp.ge.s32.totalorder %s1658_s30, 4   ;;  %s2085_s24 = smov %s1567_s25 }
 0x55a   : > { %s2086_s25 = smov %s1571_s26  ;;  %s2087_s26 = smov %s1670_s10 }
 0x55b   : > { %s2088_s27 = smov %s1658_s30  ;;  %23 = sbr.rel (!%p21_p11) target bundleno = 8 (0x8), region = 98 }
 0x562   :  { %1185 = vsyncpa [#allocation3], 1 }
 0x563   :  { %1187 = vsyncpa [#allocation3 + $0x1], 1 }
 0x564   :  { %1188 = vsyncpa [#allocation4], 1 }
 0x565   :  { %1190 = vsyncpa [#allocation4 + $0x1], 1 }
 0x566   :  { %1191 = vsyncpa [#allocation5], 1 }
 0x567   :  { %1193 = vsyncpa [#allocation5 + $0x1], 1 }

</bundles_post_ra>
